<compile_context>
chip_gen: v7x
topology: tpu7x:2x2x1
jax: 0.10.0
libtpu: 0.0.40
codegen_flags: <defaults>
</compile_context>

<pallas_src>
import numpy as np
import jax
import jax.numpy as jnp
from jax.experimental import pallas as pl
from jax.experimental.pallas import tpu as pltpu


# ----------------------------------------------------------------------------
# Pallas kernel: accumulate L @ (X W1) over column blocks, then fuse the GRU
# gate nonlinearities + ReLU + lane-dense linear head on the last column block.
#   grid = (row_tiles [parallel], col_tiles [arbitrary])
# ----------------------------------------------------------------------------
def _rgcn_kernel(l_ref, xw1_ref, xw0_ref, wlin_ref, blin_ref, out_ref, acc_ref):
    f32 = jnp.float32
    k = pl.program_id(1)
    nk = pl.num_programs(1)
    filters = wlin_ref.shape[0]

    @pl.when(k == 0)
    def _():
        # Init accumulator with the hoisted x-path term  X@Wg0 + bias  (f32).
        acc_ref[...] = xw0_ref[...]

    # Dominant stream: (tile_n, tile_k) @ (tile_k, 2F) on the MXU, f32 accumulate.
    acc_ref[...] += jnp.dot(l_ref[...], xw1_ref[...], preferred_element_type=f32)

    @pl.when(k == nk - 1)
    def _():
        pre = acc_ref[...]                               # (tile_n, 2F) f32
        z = jax.nn.sigmoid(pre[:, :filters])             # update gate
        h_tilde = jnp.tanh(pre[:, filters:])             # candidate state
        # H_new = Z * H_prev + (1 - Z) * H_tilde  ==  (1 - Z) * H_tilde  (H_prev == 0)
        h_act = jnp.maximum((1.0 - z) * h_tilde, 0.0)    # ReLU, f32

        # Lane-dense linear head: (tile_n, F) @ (F, 128); only lane 0 is real.
        # Stored in bf16 to halve the (padding-dominated) writeback bytes.
        out_ref[...] = (
            jnp.dot(h_act.astype(jnp.bfloat16), wlin_ref[...],
                    preferred_element_type=f32)
            + blin_ref[...]
        ).astype(out_ref.dtype)


# ----------------------------------------------------------------------------
# Glue: dense scaled Laplacian from edge_index / edge_weight (plain JAX)
#   ChebConv('sym', lambda_max=2.0):  L_hat = -D^{-1/2} A D^{-1/2}, zero diag.
# ----------------------------------------------------------------------------
def _build_scaled_laplacian(edge_index, edge_weight, num_nodes):
    # TODO(synk): sparse scatter-add Laplacian build stays in plain JAX (data-
    # dependent gather/scatter has no clean dense-tile Pallas pattern here).
    row, col = edge_index[0], edge_index[1]
    w = jnp.where(row == col, 0.0, edge_weight.astype(jnp.float32))  # remove_self_loops
    a = jnp.zeros((num_nodes, num_nodes), jnp.float32).at[row, col].add(w)
    deg = a.sum(axis=1)
    dinv = jnp.where(deg > 0, jax.lax.rsqrt(deg), 0.0)
    return -(dinv[:, None] * a * dinv[None, :])


# ----------------------------------------------------------------------------
# Tile / VMEM sizing helpers
# ----------------------------------------------------------------------------
def _pick_tile(total, cap, align):
    """Largest multiple of `align` that divides `total` and is <= cap (>= align)."""
    t = max((min(cap, total) // align) * align, align)
    while total % t != 0:
        t -= align
    return t


def _default_vmem_limit():
    try:
        cap = int(pltpu.get_tpu_info().vmem_capacity_bytes)
    except Exception:
        cap = 64 * 1024 * 1024
    # Leave headroom: v5e/v6e (128 MiB physical) -> ~96 MiB; v7x (64 MiB) -> ~48 MiB.
    return min(max(cap - 16 * 1024 * 1024, 32 * 1024 * 1024), 96 * 1024 * 1024)


# ----------------------------------------------------------------------------
# Wrapper: weight fusion / hoisted projections / padding + pallas_call
# ----------------------------------------------------------------------------
def recurrent_gcn_forward(x, edge_index, edge_weight, params, *,
                          tile_n=None, tile_k=None, vmem_limit_bytes=None):
    """Forward pass matching RecurrentGCN(node_features, filters).forward."""
    n_nodes, _ = x.shape
    filters = params["wxz0"].shape[1]
    two_f = 2 * filters
    bf16 = jnp.bfloat16

    l_hat = _build_scaled_laplacian(edge_index, edge_weight, n_nodes)   # (N, N) f32

    # Fuse + hoist gate projections (H_prev == 0, so every H-path Chebyshev term
    # and the r-gate vanish; x/h-conv biases are summed into bg).
    #   pre = X@Wg0 + bg + L @ (X@Wg1)        [associativity: (L X) Wg1 == L (X Wg1)]
    wg0 = jnp.concatenate([params["wxz0"], params["wxh0"]], axis=1)     # (Fin, 2F)
    wg1 = jnp.concatenate([params["wxz1"], params["wxh1"]], axis=1)     # (Fin, 2F)
    bg = jnp.concatenate([params["bz"], params["bh"]], axis=1)          # (1, 2F)
    xw0 = x.astype(jnp.float32) @ wg0 + bg                              # (N, 2F) f32
    xw1 = x.astype(jnp.float32) @ wg1                                   # (N, 2F) f32

    # Pad node count to a multiple of 128 (lane-dense L column loads, general N).
    n_pad = ((n_nodes + 127) // 128) * 128
    if n_pad != n_nodes:
        pad = n_pad - n_nodes
        l_hat = jnp.pad(l_hat, ((0, pad), (0, pad)))
        xw0 = jnp.pad(xw0, ((0, pad), (0, 0)))
        xw1 = jnp.pad(xw1, ((0, pad), (0, 0)))

    # Tile selection: row tile gives >= 2 tiles (use both v7x TCs on small graphs);
    # column tile caps the contraction block so big N stays within VMEM.
    if tile_n is None:
        tile_n = _pick_tile(n_pad, min(1024, max(8, n_pad // 2)), 8)
    if tile_k is None:
        tile_k = _pick_tile(n_pad, 2048, 128)
    if vmem_limit_bytes is None:
        vmem_limit_bytes = _default_vmem_limit()

    # Lane-dense linear head: pad (F, 1) -> (F, 128), only column 0 is meaningful.
    wlin_pad = jnp.zeros((filters, 128), jnp.float32).at[:, :1].set(params["wlin"])
    blin_pad = jnp.zeros((1, 128), jnp.float32).at[:, :1].set(params["blin"])

    # bf16 MXU inputs; accumulation / elementwise math stays f32 in-kernel.
    l_bf = l_hat.astype(bf16)
    xw1_bf = xw1.astype(bf16)
    wlin_bf = wlin_pad.astype(bf16)

    # TODO(synk): fp8 L (v7x) / block-sparse L-tile skipping via scalar-prefetched
    # nonzero tables would further cut the dominant HBM stream; needs accuracy and
    # graph-density validation, so not enabled here.

    grid = (n_pad // tile_n, n_pad // tile_k)
    out = pl.pallas_call(
        _rgcn_kernel,
        out_shape=jax.ShapeDtypeStruct((n_pad, 128), bf16),
        grid=grid,
        in_specs=[
            pl.BlockSpec((tile_n, tile_k), lambda i, k: (i, k)),   # L tile (stream)
            pl.BlockSpec((tile_k, two_f), lambda i, k: (k, 0)),    # XW1 column block
            pl.BlockSpec((tile_n, two_f), lambda i, k: (i, 0)),    # XW0 + bias row block
            pl.BlockSpec((filters, 128), lambda i, k: (0, 0)),     # padded head W
            pl.BlockSpec((1, 128), lambda i, k: (0, 0)),           # padded head b
        ],
        out_specs=pl.BlockSpec((tile_n, 128), lambda i, k: (i, 0)),
        scratch_shapes=[pltpu.VMEM((tile_n, two_f), jnp.float32)],  # gate accumulator
        compiler_params=pltpu.CompilerParams(
            dimension_semantics=("parallel", "arbitrary"),
            vmem_limit_bytes=int(vmem_limit_bytes),
        ),
    )(l_bf, xw1_bf, xw0, wlin_bf, blin_pad)

    # Real output is lane 0 of the padded slab; drop padded rows.
    return out[:n_nodes, :1].astype(jnp.float32)


# ----------------------------------------------------------------------------
# Deterministic parameter init (shapes from GConvGRU(node_features, filters, 2))
# ----------------------------------------------------------------------------
def init_params(key, node_features, filters):
    def glorot(k, shape):
        lim = np.sqrt(6.0 / (shape[0] + shape[1]))
        return jax.random.uniform(k, shape, jnp.float32, -lim, lim)

    keys = jax.random.split(key, 16)
    p = {}
    # ChebConv_x_* : two lins (Fin -> Fout); ChebConv_h_* : two lins (Fout -> Fout).
    # The x-conv and h-conv biases are summed into b{g} (exactly equivalent).
    for i, g in enumerate(["z", "r", "h"]):
        p[f"wx{g}0"] = glorot(keys[4 * i + 0], (node_features, filters))
        p[f"wx{g}1"] = glorot(keys[4 * i + 1], (node_features, filters))
        p[f"wh{g}0"] = glorot(keys[4 * i + 2], (filters, filters))
        p[f"wh{g}1"] = glorot(keys[4 * i + 3], (filters, filters))
        p[f"b{g}"] = jnp.zeros((1, filters), jnp.float32) + 0.01 * (i + 1)
    # Linear(filters, 1)
    p["wlin"] = glorot(keys[12], (filters, 1))
    p["blin"] = jnp.full((1, 1), 0.05, jnp.float32)
    return p


# ----------------------------------------------------------------------------
# Pure-JAX reference (full GRU math incl. r-gate and H-path, all f32)
# ----------------------------------------------------------------------------
def reference_forward(x, edge_index, edge_weight, params):
    L = _build_scaled_laplacian(edge_index, edge_weight, x.shape[0])
    filters = params["wxz0"].shape[1]
    h = jnp.zeros((x.shape[0], filters), jnp.float32)
    lx, lh = L @ x, L @ h
    z = jax.nn.sigmoid(x @ params["wxz0"] + lx @ params["wxz1"]
                       + h @ params["whz0"] + lh @ params["whz1"] + params["bz"])
    r = jax.nn.sigmoid(x @ params["wxr0"] + lx @ params["wxr1"]
                       + h @ params["whr0"] + lh @ params["whr1"] + params["br"])
    hr = h * r
    lhr = L @ hr
    h_tilde = jnp.tanh(x @ params["wxh0"] + lx @ params["wxh1"]
                       + hr @ params["whh0"] + lhr @ params["whh1"] + params["bh"])
    h_new = z * h + (1.0 - z) * h_tilde
    return jnp.maximum(h_new, 0.0) @ params["wlin"] + params["blin"]


if __name__ == "__main__":
    NODE_FEATURES = 8
    FILTERS = 32
    N_NODES = 16

    key = jax.random.PRNGKey(0)
    k_x, k_w, k_p = jax.random.split(key, 3)

    # Node features
    x = jax.random.normal(k_x, (N_NODES, NODE_FEATURES), jnp.float32)

    # Deterministic small graph: i <-> i+1 and i <-> i+3 (mod N), both directions
    src, dst = [], []
    for i in range(N_NODES):
        for d in (1, 3):
            j = (i + d) % N_NODES
            src += [i, j]
            dst += [j, i]
    edge_index = jnp.array([src, dst], dtype=jnp.int32)            # (2, 64)
    edge_weight = jax.random.uniform(k_w, (edge_index.shape[1],),
                                     jnp.float32, 0.5, 1.5)         # (64,)

    params = init_params(k_p, NODE_FEATURES, FILTERS)

    out = recurrent_gcn_forward(x, edge_index, edge_weight, params)
    out = jax.block_until_ready(out)

    ref = jax.block_until_ready(reference_forward(x, edge_index, edge_weight, params))
    np.testing.assert_allclose(np.asarray(out), np.asarray(ref), rtol=3e-2, atol=3e-2)
    assert out.shape == (N_NODES, 1)

    print("KERNEL_OK")
</pallas_src>

<mosaic_0001>
module attributes {stable_mosaic.version = 11 : i64} {
  func.func @_rgcn_kernel(%arg0: i32, %arg1: i32, %arg2: memref<64x128xbf16, #tpu.memory_space<vmem>>, %arg3: memref<128x64xbf16, #tpu.memory_space<vmem>>, %arg4: memref<64x64xf32, #tpu.memory_space<vmem>>, %arg5: memref<32x128xbf16, #tpu.memory_space<vmem>>, %arg6: memref<1x128xf32, #tpu.memory_space<vmem>>, %arg7: memref<64x128xbf16, #tpu.memory_space<vmem>>, %arg8: memref<64x64xf32, #tpu.memory_space<vmem>>) attributes {dimension_semantics = [#tpu.dimension_semantics<parallel>, #tpu.dimension_semantics<arbitrary>], iteration_bounds = array<i64: 2, 1>, scalar_prefetch = 0 : i64, scratch_operands = 1 : i64, tpu.core_type = #tpu.core_type<tc>, window_params = [{transform_indices = @transform_0, window_bounds = array<i64: 64, 128>}, {transform_indices = @transform_1, window_bounds = array<i64: 128, 64>}, {transform_indices = @transform_2, window_bounds = array<i64: 64, 64>}, {pipeline_mode = #tpu.pipeline_mode<synchronous>, transform_indices = @transform_3, window_bounds = array<i64: 32, 128>}, {pipeline_mode = #tpu.pipeline_mode<synchronous>, transform_indices = @transform_4, window_bounds = array<i64: 1, 128>}, {transform_indices = @transform_5, window_bounds = array<i64: 64, 128>}]} {
    %c0_i32 = arith.constant 0 : i32
    %0 = arith.cmpi eq, %arg1, %c0_i32 : i32
    %1 = arith.extui %0 : i1 to i32
    %c0_i32_0 = arith.constant 0 : i32
    %2 = arith.cmpi ne, %1, %c0_i32_0 : i32
    scf.if %2 {
      %c0_10 = arith.constant 0 : index
      %c0_11 = arith.constant 0 : index
      %12 = vector.load %arg4[%c0_10, %c0_11] : memref<64x64xf32, #tpu.memory_space<vmem>>, vector<64x64xf32>
      %c0_12 = arith.constant 0 : index
      %c0_13 = arith.constant 0 : index
      %13 = vector.load %arg8[%c0_12, %c0_13] : memref<64x64xf32, #tpu.memory_space<vmem>>, vector<64x64xf32>
      tpu.vector_store %arg8[%c0_12, %c0_13], %12 {strides = array<i32>} : memref<64x64xf32, #tpu.memory_space<vmem>>, vector<64x64xf32>,
    } else {
    }
    %c0 = arith.constant 0 : index
    %c0_1 = arith.constant 0 : index
    %3 = vector.load %arg8[%c0, %c0_1] : memref<64x64xf32, #tpu.memory_space<vmem>>, vector<64x64xf32>
    %c0_2 = arith.constant 0 : index
    %c0_3 = arith.constant 0 : index
    %4 = vector.load %arg2[%c0_2, %c0_3] : memref<64x128xbf16, #tpu.memory_space<vmem>>, vector<64x128xbf16>
    %c0_4 = arith.constant 0 : index
    %c0_5 = arith.constant 0 : index
    %5 = vector.load %arg3[%c0_4, %c0_5] : memref<128x64xbf16, #tpu.memory_space<vmem>>, vector<128x64xbf16>
    %cst = arith.constant dense<0.000000e+00> : vector<64x64xf32>
    %6 = tpu.matmul %4, %5, %cst {dimension_numbers = #tpu.dot_dimension_numbers<[1], [0], [0], [1], [0, 0, 1, 1], [], []>} : vector<64x128xbf16>, vector<128x64xbf16>, vector<64x64xf32> -> vector<64x64xf32>
    %7 = arith.addf %3, %6 : vector<64x64xf32>
    %c0_6 = arith.constant 0 : index
    %c0_7 = arith.constant 0 : index
    %8 = vector.load %arg8[%c0_6, %c0_7] : memref<64x64xf32, #tpu.memory_space<vmem>>, vector<64x64xf32>
    tpu.vector_store %arg8[%c0_6, %c0_7], %7 {strides = array<i32>} : memref<64x64xf32, #tpu.memory_space<vmem>>, vector<64x64xf32>,
    %c0_i32_8 = arith.constant 0 : i32
    %9 = arith.cmpi eq, %arg1, %c0_i32_8 : i32
    %10 = arith.extui %9 : i1 to i32
    %c0_i32_9 = arith.constant 0 : i32
    %11 = arith.cmpi ne, %10, %c0_i32_9 : i32
    scf.if %11 {
      %c0_10 = arith.constant 0 : index
      %c0_11 = arith.constant 0 : index
      %12 = vector.load %arg8[%c0_10, %c0_11] : memref<64x64xf32, #tpu.memory_space<vmem>>, vector<64x64xf32>
      %13 = vector.extract_strided_slice %12 {offsets = [0, 0], sizes = [64, 32], strides = [1, 1]} : vector<64x64xf32> to vector<64x32xf32>
      %14 = arith.negf %13 : vector<64x32xf32>
      %15 = math.exp %14 : vector<64x32xf32>
      %cst_12 = arith.constant 1.000000e+00 : f32
      %16 = vector.broadcast %cst_12 : f32 to vector<64x32xf32>
      %17 = arith.addf %16, %15 : vector<64x32xf32>
      %18 = arith.divf %16, %17 : vector<64x32xf32>
      %19 = vector.extract_strided_slice %12 {offsets = [0, 32], sizes = [64, 32], strides = [1, 1]} : vector<64x64xf32> to vector<64x32xf32>
      %20 = math.tanh %19 : vector<64x32xf32>
      %cst_13 = arith.constant 1.000000e+00 : f32
      %21 = vector.broadcast %cst_13 : f32 to vector<64x32xf32>
      %22 = arith.subf %21, %18 : vector<64x32xf32>
      %23 = arith.mulf %22, %20 : vector<64x32xf32>
      %cst_14 = arith.constant 0.000000e+00 : f32
      %24 = vector.broadcast %cst_14 : f32 to vector<64x32xf32>
      %25 = arith.maximumf %23, %24 : vector<64x32xf32>
      %26 = arith.truncf %25 : vector<64x32xf32> to vector<64x32xbf16>
      %c0_15 = arith.constant 0 : index
      %c0_16 = arith.constant 0 : index
      %27 = vector.load %arg5[%c0_15, %c0_16] : memref<32x128xbf16, #tpu.memory_space<vmem>>, vector<32x128xbf16>
      %cst_17 = arith.constant dense<0.000000e+00> : vector<64x128xf32>
      %28 = tpu.matmul %26, %27, %cst_17 {dimension_numbers = #tpu.dot_dimension_numbers<[1], [0], [0], [1], [0, 0, 1, 1], [], []>} : vector<64x32xbf16>, vector<32x128xbf16>, vector<64x128xf32> -> vector<64x128xf32>
      %c0_18 = arith.constant 0 : index
      %c0_19 = arith.constant 0 : index
      %29 = vector.load %arg6[%c0_18, %c0_19] : memref<1x128xf32, #tpu.memory_space<vmem>>, vector<1x128xf32>
      %30 = vector.broadcast %29 : vector<1x128xf32> to vector<64x128xf32>
      %31 = arith.addf %28, %30 : vector<64x128xf32>
      %32 = arith.truncf %31 : vector<64x128xf32> to vector<64x128xbf16>
      %c0_20 = arith.constant 0 : index
      %c0_21 = arith.constant 0 : index
      %33 = vector.load %arg7[%c0_20, %c0_21] : memref<64x128xbf16, #tpu.memory_space<vmem>>, vector<64x128xbf16>
      tpu.vector_store %arg7[%c0_20, %c0_21], %32 {strides = array<i32>} : memref<64x128xbf16, #tpu.memory_space<vmem>>, vector<64x128xbf16>,
    } else {
    }
    return
  }
  func.func @transform_0(%arg0: i32, %arg1: i32) -> (i32, i32) {
    %c0_i32 = arith.constant 0 : i32
    return %arg0, %arg1 : i32, i32
  }
  func.func @transform_1(%arg0: i32, %arg1: i32) -> (i32, i32) {
    %c0_i32 = arith.constant 0 : i32
    %c0_i32_0 = arith.constant 0 : i32
    return %arg1, %c0_i32 : i32, i32
  }
  func.func @transform_2(%arg0: i32, %arg1: i32) -> (i32, i32) {
    %c0_i32 = arith.constant 0 : i32
    %c0_i32_0 = arith.constant 0 : i32
    return %arg0, %c0_i32 : i32, i32
  }
  func.func @transform_3(%arg0: i32, %arg1: i32) -> (i32, i32) {
    %c0_i32 = arith.constant 0 : i32
    %c0_i32_0 = arith.constant 0 : i32
    %c0_i32_1 = arith.constant 0 : i32
    return %c0_i32, %c0_i32_0 : i32, i32
  }
  func.func @transform_4(%arg0: i32, %arg1: i32) -> (i32, i32) {
    %c0_i32 = arith.constant 0 : i32
    %c0_i32_0 = arith.constant 0 : i32
    %c0_i32_1 = arith.constant 0 : i32
    return %c0_i32, %c0_i32_0 : i32, i32
  }
  func.func @transform_5(%arg0: i32, %arg1: i32) -> (i32, i32) {
    %c0_i32 = arith.constant 0 : i32
    %c0_i32_0 = arith.constant 0 : i32
    return %arg0, %c0_i32 : i32, i32
  }
}

</mosaic_0001>

<bundles_post_ra>
// kernel: tpu_custom_call.1
= control target key start
LH: loop header
LB: loop body
LE: loop exit
PB: predicated region body
PF: predicated region fallthrough
CT: control target
= control target key end

     0   :  { %10 = vsyncpa [#allocation4], 0  ;;  %s1438_s0 = inlined_call_operand.vmem [shape: bf16[128,128], index: 0, kind: input, shape index: {}]   ;;  %s1439_s1 = inlined_call_operand.vmem [shape: bf16[128,64], index: 1, kind: input, shape index: {}]   ;;  %s1440_s2 = inlined_call_operand.vmem [shape: f32[128,64], index: 2, kind: input, shape index: {}]   ;;  %s1441_s3 = inlined_call_operand.vmem [shape: bf16[32,128], index: 3, kind: input, shape index: {}]   ;;  %s1442_s4 = inlined_call_operand.vmem [shape: f32[1,128], index: 4, kind: input, shape index: {}]   ;;  %s1443_s5 = inlined_call_operand.hbm [shape: bf16[128,128], index: 5, kind: output, shape index: {}]  }
   0x1   :  { %12 = vsyncpa [#allocation4 + $0x1], 0  ;;  %s1254_s18 = smov 0   ;;  %s1256_s19 = smov 0  }
   0x2   :  { %s1258_s20 = smov 0   ;;  %s1260_s21 = smov 0  }
   0x3   :  { %s1262_s22 = smov 0   ;;  %s1264_s23 = smov 0  }
   0x4 LB: > { %s883_s24 = sadd.s32 4294967295, %s1218_s23   ;;  %s884_s25 = sadd.s32 4294967294, %s1218_s23   ;;  %s1218_s23 = sphi %s1264_s23, %s18_s23   ;;  %s1214_s22 = sphi %s1262_s22, %s1450_s22   ;;  %s1210_s21 = sphi %s1260_s21, %s1449_s21   ;;  %s1206_s20 = sphi %s1258_s20, %s1448_s20   ;;  %s1202_s19 = sphi %s1256_s19, %s1447_s19   ;;  %s1198_s18 = sphi %s1254_s18, %s1446_s18  }
   0x5   : > { %s30_s26 = sadd.s32 1, %s1214_s22  ;;  %s159_s27 = sadd.s32 1, %s1206_s20 }
   0x6   : > { %p32_p0 = scmp.ge.s32.totalorder %s30_s26, 2  ;;  %p169_p1 = scmp.ne.s32.totalorder %s1206_s20, %s1202_s19 }
   0x7   : > { %p170_p2 = scmp.eq.s32.totalorder %s883_s24, 1  ;;  %p175_p3 = scmp.ne.s32.totalorder %s1202_s19, %s1198_s18 }
   0x8   : > { %s1452_s26 = smov (%p32_p0, %s30_s26), 0  ;;  %p176_p5 = scmp.eq.s32.totalorder %s884_s25, 1 }
   0x9   : > { %p1294_p4 = por %p170_p2, %p169_p1  ;;  %s156_s29 = ssub.s32 %s1214_s22, %s1452_s26 }
   0xa   : > { %p888_p6 = scmp.ge.s32.totalorder %s1218_s23, 1  ;;  %p157_p7 = scmp.eq.s32.totalorder %s156_s29, 0 }
   0xb   : > { %p1301_p8 = por %p176_p5, %p175_p3  ;;  %p230_p9 = scmp.lt.s32.totalorder %s1218_s23, 3 }
   0xc   : > { %s1307_s6 = scalar_select %p157_p7, %s1206_s20, %s159_s27  }
   0xd   : > { %p231_p10 = pnand %p888_p6, %p230_p9 }
   0xe   : > { %v1078_v0 = vld [vmem:[%s1439_s1] sm:$0xff] (!%p231_p10)   ;;  %s890_s9 = sshll.u32 (!%p231_p10), %s1210_s21, 3  ;;  %v1079_v1 = vld [vmem:[%s1439_s1 + $0x8] sm:$0xff] (!%p231_p10)   ;;  %v1080_v2 = vld [vmem:[%s1439_s1 + $0x10] sm:$0xff] (!%p231_p10)   ;;  %vm306_vm0 = vcmask (!%p231_p10), 523264   ;;  %s1220_s29 = smov (!%p231_p10), 96  }
   0xf   : > { %234 = sbr.rel (%p231_p10) target bundleno = 650 (0x28a), region = 40  ;;  %p272_p11 = scmp.lt.s32.totalorder (!%p231_p10), %s890_s9, 15  ;;  %984 = vmatprep.subr.bf16.mxu0 (!%p231_p10), %v1078_v0  ;;  %v1081_v3 = vld [vmem:[%s1439_s1 + $0x18] sm:$0xff] (!%p231_p10)   ;;  %v1082_v5 = vld [vmem:[%s1439_s1 + $0x20] sm:$0xff] (!%p231_p10)   ;;  %v1083_v7 = vld [vmem:[%s1439_s1 + $0x28] sm:$0xff] (!%p231_p10)   ;;  %vm651_vm1 = vcmask (!%p231_p10), 261120  }
  0x10   : > { %985 = vmatpush3.bf16.msra.mxu0 (!%p231_p10), %v1078_v0  ;;  %v1084_v8 = vld [vmem:[%s1439_s1 + $0x30] sm:$0xff] (!%p231_p10)   ;;  %v1085_v9 = vld [vmem:[%s1439_s1 + $0x38] sm:$0xff] (!%p231_p10)   ;;  %v1090_v48 = vld [vmem:[%s1441_s3] sm:$0xff] (!%p231_p10)   ;;  %s268_s7 = sand.u32 (!%p231_p10), 1, %s1202_s19   ;;  %s942_s13 = sshll.u32 (!%p231_p10), %s1210_s21, 9 }
  0x11   : > { %986 = vmatprep.subr.bf16.mxu0 (!%p231_p10), %v1079_v1  ;;  %1008 = vmatprep.subr.bf16.mxu1 (!%p231_p10), %v1090_v48  ;;  %v1091_v49 = vld [vmem:[%s1441_s3 + $0x8] sm:$0xff] (!%p231_p10)   ;;  %s889_s11 = sshll.u32 (!%p231_p10), %s268_s7, 5  ;;  %s1388_s16 = scalar_lea.hbm (!%p231_p10), %s1443_s5, %s942_s13 }
  0x12   : > { %1009 = vmatpush3.bf16.msra.mxu1 (!%p231_p10), %v1090_v48 }
  0x13   : > { %1010 = vmatprep.subr.bf16.mxu1 (!%p231_p10), %v1091_v49 }
  0x14   : > { %987 = vmatpush3.bf16.msra.mxu0 (!%p231_p10), %v1079_v1 }
  0x15   : > { %988 = vmatprep.subr.bf16.mxu0 (!%p231_p10), %v1080_v2 }
  0x16   : > { %s1454_s9 = smov (!%p272_p11, %s890_s9), 15  ;;  %1011 = vmatpush3.bf16.msra.mxu1 %v1091_v49 }
  0x17   : > { %s891_s14 = sshll.u32 %s1454_s9, 2  ;;  %s893_s24 = sshll.u32 %s1454_s9, 3 }
  0x18   : > { %s278_s17 = scalar_lea.vmem %s1438_s0, %s891_s14  ;;  %s1328_s8 = scalar_lea.vmem %s1440_s2, %s893_s24  ;;  %989 = vmatpush3.bf16.msra.mxu0 %v1080_v2 }
  0x19   : > { %v1086_v4 = vld [vmem:[%s278_s17] sm:$0xff]   ;;  %990 = vmatprep.subr.bf16.mxu0 %v1081_v3  ;;  %v300_v6 = vld [vmem:[%s1328_s8 + $0x10] sm:$0xff]  ;;  %v1087_v10 = vld [vmem:[%s278_s17 + $0x8] sm:$0xff]   ;;  %s270_s9 = scalar_lea.vmem [#allocation3], %s889_s11  ;;  %s1221_s24 = smov [#allocation3]  }
  0x1a   : > { %1000 = vmatprep.mubr.bf16.mxu0 %v1086_v4  ;;  %309 = vst.msk [vmem:[#allocation2 + $0x10] sm:$0xff] %vm306_vm0, %v300_v6  ;;  %v1088_v11 = vld [vmem:[%s278_s17 + $0x10] sm:$0xff]   ;;  %v1089_v12 = vld [vmem:[%s278_s17 + $0x18] sm:$0xff]   ;;  %v298_v13 = vld [vmem:[%s1328_s8] sm:$0xff]  ;;  %s783_s12 = sshll.u32 %s270_s9, 4  ;;  %s1392_s17 = scalar_lea.sflag [#allocation4], %s268_s7  ;;  %s1383_s12 = int_to_ptr.vmem [resolvable:$true] %s783_s12 }
  0x1b   : > { %307 = vst.msk [vmem:[#allocation2] sm:$0xff] %vm306_vm0, %v298_v13  ;;  %v301_v14 = vld [vmem:[%s1328_s8 + $0x18] sm:$0xff]  ;;  %v299_v15 = vld [vmem:[%s1328_s8 + $0x8] sm:$0xff]  ;;  %v304_v16 = vld [vmem:[%s1328_s8 + $0x30] sm:$0xff]  ;;  %s1140_s21 = scalar_lea.vmem %s1383_s12, 512  ;;  %s1144_s25 = sshll.u32 %s1221_s24, 4  ;;  %s1145_s25 = int_to_ptr.vmem [resolvable:$false] %s1144_s25 }
  0x1c   : > { %991 = vmatpush3.bf16.msra.mxu0 %v1081_v3  ;;  %310 = vst.msk [vmem:[#allocation2 + $0x18] sm:$0xff] %vm306_vm0, %v301_v14  ;;  %308 = vst.msk [vmem:[#allocation2 + $0x8] sm:$0xff] %vm306_vm0, %v299_v15  ;;  %v302_v17 = vld [vmem:[%s1328_s8 + $0x20] sm:$0xff]  ;;  %v305_v18 = vld [vmem:[%s1328_s8 + $0x38] sm:$0xff]  ;;  %p1141_p12 = scmp.ne.s32.totalorder %s1383_s12, %s1140_s21  ;;  %s1146_s27 = scalar_lea.vmem %s1145_s25, 1024 }
  0x1d   : > { %992 = vmatprep.subr.bf16.mxu0 %v1082_v5  ;;  %313 = vst.msk [vmem:[#allocation2 + $0x30] sm:$0xff] %vm306_vm0, %v304_v16  ;;  %311 = vst.msk [vmem:[#allocation2 + $0x20] sm:$0xff] %vm306_vm0, %v302_v17  ;;  %v303_v19 = vld [vmem:[%s1328_s8 + $0x28] sm:$0xff]  ;;  %p1147_p1 = scmp.lt.s32.totalorder %s1383_s12, %s1145_s25  ;;  %p1148_p2 = scmp.lt.s32.totalorder %s1146_s27, %s1140_s21 }
  0x1e   : > { %314 = vst.msk [vmem:[#allocation2 + $0x38] sm:$0xff] %vm306_vm0, %v305_v18  ;;  %312 = vst.msk [vmem:[#allocation2 + $0x28] sm:$0xff] %vm306_vm0, %v303_v19  ;;  %p1142_p13 = pnand %p1141_p12, %p1294_p4 }
  0x1f   : > { %p1149_p3 = por %p1148_p2, %p1147_p1 }
  0x20   : > { %993 = vmatpush3.bf16.msra.mxu0 %v1082_v5  ;;  %p1143_p0 = pneg %p1142_p13 }
  0x21   : > { %994 = vmatprep.subr.bf16.mxu0 %v1083_v7  ;;  %v317_v20 = vld [vmem:[#allocation2 + $0x10] sm:$0xff] }
  0x22   : > { %v315_v21 = vld [vmem:[#allocation2] sm:$0xff]  ;;  %p1150_p5 = pnand %p1149_p3, %p1143_p0 }
  0x23   : > { %v318_v23 = vld [vmem:[#allocation2 + $0x18] sm:$0xff]  ;;  %v316_v26 = vld [vmem:[#allocation2 + $0x8] sm:$0xff] }
  0x24   : > { %995 = vmatpush3.bf16.msra.mxu0 %v1083_v7  ;;  %v321_v32 = vld [vmem:[#allocation2 + $0x30] sm:$0xff]  ;;  %v319_v33 = vld [vmem:[#allocation2 + $0x20] sm:$0xff] }
  0x25   : > { %996 = vmatprep.subr.bf16.mxu0 %v1084_v8  ;;  %v322_v35 = vld [vmem:[#allocation2 + $0x38] sm:$0xff]  ;;  %v320_v38 = vld [vmem:[#allocation2 + $0x28] sm:$0xff] }
  0x28   : > { %997 = vmatpush3.bf16.msra.mxu0 %v1084_v8 }
  0x29   : > { %998 = vmatprep.subr.bf16.mxu0 %v1085_v9 }
  0x2c   : > { %999 = vmatpush3.bf16.msra.mxu0 %v1085_v9 }
  0x2f   : > { %1001 = vmatmul.mubr.bf16.vlgmr.msra.gmra.mrb[0].mxu0 %v1087_v10 }
  0x30   : > { %1004 = vmatprep.mubr.bf16.mxu0 %v1088_v11 }
  0x37   : > { %1005 = vmatmul.mubr.bf16.gmra.mrb[4].mxu0 %v1089_v12 }
 0x102   : > { %v1002_v22 = vpop.f32.mrb[0].mxu0 }
 0x103   : > { %v486_v24 = vadd.f32 %v1002_v22, %v317_v20  ;;  %v453_v25 = vpop.f32.mrb[1].mxu0 }
 0x104   : > { %v484_v27 = vadd.f32 %v453_v25, %v315_v21  ;;  %v1003_v28 = vpop.f32.mrb[2].mxu0 }
 0x105   : > { %495 = vst.msk [vmem:[#allocation2 + $0x10] sm:$0xff] %vm306_vm0, %v486_v24  ;;  %v487_v29 = vadd.f32 %v1003_v28, %v318_v23  ;;  %v456_v30 = vpop.f32.mrb[3].mxu0 }
 0x106   : > { %493 = vst.msk [vmem:[#allocation2] sm:$0xff] %vm306_vm0, %v484_v27  ;;  %v485_v31 = vadd.f32 %v456_v30, %v316_v26 }
 0x107   : > { %496 = vst.msk [vmem:[#allocation2 + $0x18] sm:$0xff] %vm306_vm0, %v487_v29 }
 0x108   : > { %494 = vst.msk [vmem:[#allocation2 + $0x8] sm:$0xff] %vm306_vm0, %v485_v31 }
 0x10a   : > { %v1006_v34 = vpop.f32.mrb[4].mxu0 }
 0x10b   : > { %v490_v36 = vadd.f32 %v1006_v34, %v321_v32  ;;  %v469_v37 = vpop.f32.mrb[5].mxu0 }
 0x10c   : > { %v488_v39 = vadd.f32 %v469_v37, %v319_v33  ;;  %v1007_v40 = vpop.f32.mrb[6].mxu0  ;;  %v506_v41 = vld [vmem:[#allocation2 + $0x10] sm:$0xff] }
 0x10d   : > { %499 = vst.msk [vmem:[#allocation2 + $0x30] sm:$0xff] %vm306_vm0, %v490_v36  ;;  %v491_v42 = vadd.f32 %v1007_v40, %v322_v35  ;;  %v472_v43 = vpop.f32.mrb[7].mxu0  ;;  %1092 = vtanh.f32 %v506_v41  ;;  %v504_v44 = vld [vmem:[#allocation2] sm:$0xff]  ;;  %v908_v62 = vmul.f32 -1.442695, %v506_v41 }
 0x10e   : > { %497 = vst.msk [vmem:[#allocation2 + $0x20] sm:$0xff] %vm306_vm0, %v488_v39  ;;  %v489_v45 = vadd.f32 %v472_v43, %v320_v38  ;;  %1094 = vtanh.f32 %v504_v44  ;;  %v507_v46 = vld [vmem:[#allocation2 + $0x18] sm:$0xff]  ;;  %v906_v63 = vmul.f32 -1.442695, %v504_v44 }
 0x10f   : > { %500 = vst.msk [vmem:[#allocation2 + $0x38] sm:$0xff] %vm306_vm0, %v491_v42  ;;  %v505_v47 = vld [vmem:[#allocation2 + $0x8] sm:$0xff]  ;;  %1096 = vtanh.f32 %v507_v46  ;;  %v909_v0 = vmul.f32 -1.442695, %v507_v46 }
 0x110   : > { %498 = vst.msk [vmem:[#allocation2 + $0x28] sm:$0xff] %vm306_vm0, %v489_v45  ;;  %1098 = vtanh.f32 %v505_v47  ;;  %v907_v1 = vmul.f32 -1.442695, %v505_v47 }
 0x114   : > { %v510_v53 = vld [vmem:[#allocation2 + $0x30] sm:$0xff] }
 0x115   : > { %v508_v50 = vld [vmem:[#allocation2 + $0x20] sm:$0xff]  ;;  %v912_v4 = vmul.f32 -1.442695, %v510_v53 }
 0x116   : > { %1100 = vtanh.f32 %v508_v50  ;;  %v511_v55 = vld [vmem:[#allocation2 + $0x38] sm:$0xff]  ;;  %v910_v2 = vmul.f32 -1.442695, %v508_v50 }
 0x117   : > { %v1093_v51 = vpop.eup %1092  ;;  %v509_v52 = vld [vmem:[#allocation2 + $0x28] sm:$0xff]  ;;  %v913_v5 = vmul.f32 -1.442695, %v511_v55 }
 0x118   : > { %v1095_v54 = vpop.eup %1094  ;;  %588 = vrot.lane.b32.xlu1 %v1093_v51, %s1220_s29  ;;  %1102 = vtanh.f32 %v509_v52  ;;  %v911_v3 = vmul.f32 -1.442695, %v509_v52 }
 0x119   : > { %584 = vrot.lane.b32.xlu0 %v1095_v54, %s1220_s29  ;;  %1104 = vtanh.f32 %v510_v53  ;;  %v1097_v56 = vpop.eup %1096 }
 0x11a   : > { %v1099_v57 = vpop.eup %1098  ;;  %1106 = vtanh.f32 %v511_v55 }
 0x11b   : > { %1108 = vpow2.f32 %v908_v62 }
 0x11c   : > { %590 = vrot.lane.b32.xlu1 %v1097_v56, %s1220_s29  ;;  %1110 = vpow2.f32 %v906_v63 }
 0x11d   : > { %586 = vrot.lane.b32.xlu0 %v1099_v57, %s1220_s29  ;;  %1112 = vpow2.f32 %v909_v0 }
 0x11e   : > { %1114 = vpow2.f32 %v907_v1 }
 0x11f   : > { %1116 = vpow2.f32 %v910_v2 }
 0x120   : > { %v1101_v58 = vpop.eup %1100  ;;  %1118 = vpow2.f32 %v911_v3  ;;  %v914_v3 = vld [vmem:[%s1442_s4] ss:$0 sm:$0xff] }
 0x121   : > { %592 = vrot.lane.b32.xlu0 %v1101_v58, %s1220_s29  ;;  %1120 = vpow2.f32 %v912_v4 }
 0x122   : > { %v1103_v59 = vpop.eup %1102  ;;  %1122 = vpow2.f32 %v913_v5 }
 0x123   : > { %594 = vrot.lane.b32.xlu1 %v1103_v59, %s1220_s29  ;;  %v1105_v60 = vpop.eup %1104 }
 0x124   : > { %v1107_v61 = vpop.eup %1106 }
 0x125   : > { %596 = vrot.lane.b32.xlu0 %v1105_v60, %s1220_s29  ;;  %v1109_v6 = vpop.eup %1108 }
 0x126   : > { %v1111_v7 = vpop.eup %1110  ;;  %v538_v10 = vadd.f32 1.0, %v1109_v6 }
 0x127   : > { %598 = vrot.lane.b32.xlu1 %v1107_v61, %s1220_s29  ;;  %v1113_v8 = vpop.eup %1112  ;;  %v536_v11 = vadd.f32 1.0, %v1111_v7 }
 0x128   : > { %v1115_v9 = vpop.eup %1114  ;;  %v539_v12 = vadd.f32 1.0, %v1113_v8  ;;  %1124 = vrcp.f32 %v538_v10 }
 0x129   : > { %v537_v13 = vadd.f32 1.0, %v1115_v9  ;;  %v1117_v14 = vpop.eup %1116  ;;  %1126 = vrcp.f32 %v536_v11 }
 0x12a   : > { %v1119_v15 = vpop.eup %1118  ;;  %1128 = vrcp.f32 %v539_v12  ;;  %v540_v16 = vadd.f32 1.0, %v1117_v14 }
 0x12b   : > { %1130 = vrcp.f32 %v537_v13  ;;  %v1121_v17 = vpop.eup %1120  ;;  %v541_v18 = vadd.f32 1.0, %v1119_v15 }
 0x12c   : > { %v1123_v19 = vpop.eup %1122  ;;  %1132 = vrcp.f32 %v540_v16  ;;  %v542_v20 = vadd.f32 1.0, %v1121_v17 }
 0x12d   : > { %1134 = vrcp.f32 %v541_v18  ;;  %v543_v21 = vadd.f32 1.0, %v1123_v19 }
 0x12e   : > { %1136 = vrcp.f32 %v542_v20 }
 0x12f   : > { %1138 = vrcp.f32 %v543_v21 }
 0x132   : > { %v1125_v22 = vpop.eup %1124 }
 0x133   : > { %v1127_v23 = vpop.eup %1126  ;;  %v570_v27 = vsub.f32 1.0, %v1125_v22 }
 0x134   : > { %v1129_v24 = vpop.eup %1128  ;;  %v568_v29 = vsub.f32 1.0, %v1127_v23 }
 0x135   : > { %v1131_v26 = vpop.eup %1130  ;;  %v571_v31 = vsub.f32 1.0, %v1129_v24 }
 0x136   : > { %v569_v34 = vsub.f32 1.0, %v1131_v26  ;;  %v1133_v35 = vpop.eup %1132 }
 0x137   : > { %v1135_v39 = vpop.eup %1134  ;;  %v572_v44 = vsub.f32 1.0, %v1133_v35 }
 0x138   : > { %v1137_v45 = vpop.eup %1136  ;;  %v573_v49 = vsub.f32 1.0, %v1135_v39 }
 0x139   : > { %v1139_v51 = vpop.eup %1138  ;;  %v574_v54 = vsub.f32 1.0, %v1137_v45 }
 0x13a   : > { %v575_v59 = vsub.f32 1.0, %v1139_v51 }
 0x18a   : > { %v589_v25 = vpop.permute.xlu1 %588 }
 0x18b   : > { %v585_v28 = vpop.permute.xlu0 %584  ;;  %v610_v30 = vmul.f32 %v589_v25, %v570_v27 }
 0x18c   : > { %v608_v32 = vmul.f32 %v585_v28, %v568_v29 }
 0x18d   : > { %v618_v40 = vmax.f32 %v610_v30, 0.0 }
 0x18e   : > { %v591_v33 = vpop.permute.xlu1 %590  ;;  %v616_v42 = vmax.f32 %v608_v32, 0.0 }
 0x18f   : > { %v611_v36 = vmul.f32 %v591_v33, %v571_v31  ;;  %v587_v37 = vpop.permute.xlu0 %586 }
 0x190   : > { %v609_v38 = vmul.f32 %v587_v37, %v569_v34 }
 0x191   : > { %v619_v41 = vmax.f32 %v611_v36, 0.0 }
 0x192   : > { %v617_v43 = vmax.f32 %v609_v38, 0.0 }
 0x193   : > { %v625_v46 = vpack.c.bf16 %v619_v41, %v618_v40  ;;  %v593_v47 = vpop.permute.xlu0 %592 }
 0x194   : > { %v612_v48 = vmul.f32 %v593_v47, %v572_v44  ;;  %v624_v50 = vpack.c.bf16 %v617_v43, %v616_v42 }
 0x195   : > { %v595_v52 = vpop.permute.xlu1 %594 }
 0x196   : > { %v613_v53 = vmul.f32 %v595_v52, %v573_v49  ;;  %1012 = vmatprep.mubr.msk.bf16.mxu1 %vm651_vm1, %v624_v50  ;;  %v620_v56 = vmax.f32 %v612_v48, 0.0 }
 0x197   : > { %1013 = vmatmul.mubr.msk.bf16.vlgmr.msra.gmra.mrb[0].mxu1 %vm651_vm1, %v625_v46  ;;  %v597_v55 = vpop.permute.xlu0 %596 }
 0x198   : > { %v621_v57 = vmax.f32 %v613_v53, 0.0  ;;  %v614_v58 = vmul.f32 %v597_v55, %v574_v54 }
 0x199   : > { %v599_v60 = vpop.permute.xlu1 %598 }
 0x19a   : > { %v626_v61 = vpack.c.bf16 %v621_v57, %v620_v56  ;;  %v615_v62 = vmul.f32 %v599_v60, %v575_v59  ;;  %v622_v63 = vmax.f32 %v614_v58, 0.0 }
 0x19c   : > { %v623_v0 = vmax.f32 %v615_v62, 0.0  ;;  %1016 = vmatprep.mubr.msk.bf16.mxu1 %vm651_vm1, %v626_v61 }
 0x19e   : > { %v627_v1 = vpack.c.bf16 %v623_v0, %v622_v63 }
 0x1a0   : > { %1017 = vmatmul.mubr.msk.bf16.gmra.mrb[4].mxu1 %vm651_vm1, %v627_v1 }
 0x26a   : > { %v1014_v2 = vpop.f32.mrb[0].mxu1 }
 0x26b   : > { %v698_v4 = vpop.f32.mrb[1].mxu1  ;;  %v707_v6 = vadd.f32 %v1014_v2, %v914_v3 }
 0x26c   : > { %v1015_v5 = vpop.f32.mrb[2].mxu1  ;;  %v699_v9 = vadd.f32 %v914_v3, %v698_v4 }
 0x26d   : > { %v710_v7 = vadd.f32 %v1015_v5, %v914_v3  ;;  %v701_v8 = vpop.f32.mrb[3].mxu1 }
 0x26e   : > { %v702_v10 = vadd.f32 %v914_v3, %v701_v8 }
 0x26f   : > { %v951_v11 = vpack.c.bf16 %v710_v7, %v707_v6 }
 0x270   : > { %v946_v12 = vpack.c.bf16 %v702_v10, %v699_v9 }
 0x271   : > { %963 = vst [vmem:[%s270_s9 + $0x8] sm:$0xff] %v951_v11  }
 0x272   : > { %947 = vst [vmem:[%s270_s9] sm:$0xff] %v946_v12  }
 0x273   : > { %v1018_v13 = vpop.f32.mrb[4].mxu1 }
 0x274   : > { %v714_v14 = vpop.f32.mrb[5].mxu1  ;;  %v723_v16 = vadd.f32 %v1018_v13, %v914_v3 }
 0x275   : > { %v1019_v15 = vpop.f32.mrb[6].mxu1  ;;  %v715_v19 = vadd.f32 %v914_v3, %v714_v14 }
 0x276   : > { %v726_v17 = vadd.f32 %v1019_v15, %v914_v3  ;;  %v717_v18 = vpop.f32.mrb[7].mxu1 }
 0x277   : > { %v718_v20 = vadd.f32 %v914_v3, %v717_v18 }
 0x278   : > { %v961_v21 = vpack.c.bf16 %v726_v17, %v723_v16 }
 0x279   : > { %v956_v22 = vpack.c.bf16 %v718_v20, %v715_v19 }
 0x27a   : > { %965 = vst [vmem:[%s270_s9 + $0x18] sm:$0xff] %v961_v21  }
 0x27b   : > { %964 = vst [vmem:[%s270_s9 + $0x10] sm:$0xff] %v956_v22  }
 0x27c   : > { %1153 = shalt.err (!%p1150_p5)
}
 0x27d   : > { %s1154_s29 = scalar_lea.hbm %s1388_s16, 512  ;;  %s1158_s10 = scalar_lea.hbm %s1443_s5, 1024 }
 0x27e   : > { %p1155_p6 = scmp.ne.s32.totalorder %s1388_s16, %s1154_s29  ;;  %p1159_p10 = scmp.lt.u32.totalorder %s1388_s16, %s1443_s5 }
 0x27f   : > { %p1160_p11 = scmp.lt.u32.totalorder %s1158_s10, %s1154_s29  ;;  %p1162_p13 = scmp.lt.u32.totalorder %s1154_s29, %s1388_s16 }
 0x280   : > { %p1156_p7 = pnand %p1155_p6, %p1294_p4 }
 0x281   : > { %p1161_p12 = por %p1160_p11, %p1159_p10 }
 0x282   : > { %p1157_p9 = pneg %p1156_p7 }
 0x283   : > { %p1163_p0 = por %p1162_p13, %p1161_p12 }
 0x285   : > { %p1164_p1 = pnand %p1163_p0, %p1157_p9 }
 0x287   : > { %1167 = shalt.err (!%p1164_p1)
}
 0x288   : > { %s1222_s13 = smov 64   ;;  %s1223_s14 = smov 4  }
 0x289   : > { %1020 = dma.vmem_to_hbm [thread:$0]  (%p1294_p4), %s1383_s12, 512, %s1388_s16, %s1392_s17, %s1222_s13, %s1222_s13, %s1223_s14  }
 0x28a PF: > { %p1026_p2 = scmp.ge.s32.totalorder %s1218_s23, 2  ;;  %s798_s15 = sand.u32 1, %s1198_s18  }
 0x28b   : > { %s799_s21 = scalar_lea.sflag [#allocation4], %s798_s15 }
 0x28c   : > { %p1023_p3 = pnand %p1026_p2, %p1301_p8 }
 0x28e   : > { %1193 = dma.done.wait (!%p1023_p3), %s799_s21, 512  }
 0x28f   : > { %1195 = vsyncadd (!%p1023_p3), %s799_s21, 4294966784  ;;  %s18_s23 = sadd.s32 1, %s1218_s23   ;;  %s1446_s18 = smov %s1202_s19 }
 0x290   : > { %p15_p5 = scmp.ge.s32.totalorder %s18_s23, 4   ;;  %s1447_s19 = smov %s1206_s20 }
 0x291   : > { %s1448_s20 = smov %s1307_s6  ;;  %s1449_s21 = smov %s1214_s22 }
 0x292   : > { %s1450_s22 = smov %s1452_s26  ;;  %17 = sbr.rel (!%p15_p5) target bundleno = 4 (0x4), region = 89 }
 0x299   :  { %804 = vsyncpa [#allocation4], 1 }
 0x29a   :  { %806 = vsyncpa [#allocation4 + $0x1], 1 }

</bundles_post_ra>
